<compile_context>
chip_gen: v5e
topology: v5e:2x2
jax: 0.10.0
libtpu: 0.0.40
codegen_flags: <defaults>
</compile_context>

<pallas_src>
import jax
import jax.numpy as jnp
import numpy as np
from jax.experimental import pallas as pl
from jax.experimental.pallas import tpu as pltpu

_BIG = 1e30            # "infinite" squared distance used for masking
_IDX_SENTINEL = 1e9    # sentinel index (kept in f32), larger than any real S


# ----------------------------- fused kernel ---------------------------------

def _make_fused_kernel(num_layers, has_p1, s_is_one, chunk, n_chunks):
    def kernel(*refs):
        pos = 0
        xyz1_ref = refs[pos]; pos += 1      # [1, C,  TN]
        xyz2_ref = refs[pos]; pos += 1      # [1, Sp, C+1]   (-2*xyz2 | |xyz2|^2)
        pts2_ref = refs[pos]; pos += 1      # [1, D2, S]
        if has_p1:
            p1_ref = refs[pos]; pos += 1    # [1, D1, TN]
        layer_refs = refs[pos:-1]
        out_ref = refs[-1]                  # [1, Cout, TN]

        TN = out_ref.shape[2]
        pts2 = pts2_ref[0].astype(jnp.float32)               # [D2, S]
        D2, S = pts2.shape

        if s_is_one:
            # S == 1: "interpolation" is just repeating the single point.
            interp = jnp.broadcast_to(pts2, (D2, TN))
        else:
            xyz1 = xyz1_ref[0].astype(jnp.float32)            # [C, TN]
            C = xyz1.shape[0]

            # |xyz1|^2 (constant over s: only needed for the 1/d weights).
            n1 = xyz1[0:1, :] * xyz1[0:1, :]
            for c in range(1, C):
                n1 = n1 + xyz1[c:c + 1, :] * xyz1[c:c + 1, :]

            # Row indices kept as (exact) integer-valued f32 so all argmin
            # bookkeeping uses f32 compares / min-reductions only.
            rows0 = jax.lax.broadcasted_iota(
                jnp.int32, (chunk, TN), 0).astype(jnp.float32)

            def nn_pass(prev_idx):
                """One streaming first-occurrence argmin over S; rows listed in
                `prev_idx` (earlier neighbours) are excluded."""
                def body(ci, carry):
                    dmin, imin = carry
                    start = ci * chunk
                    if n_chunks > 1:
                        start = pl.multiple_of(start, chunk)
                        rows = rows0 + (ci * chunk).astype(jnp.float32)
                    else:
                        rows = rows0
                    aug = xyz2_ref[0, pl.ds(start, chunk), :]           # [chunk,C+1]
                    # score[s,n] = |xyz2_s|^2 - 2<xyz2_s, xyz1_n>; the cross
                    # term is one MXU matmul (full f32 so the neighbour
                    # ordering matches the f32 reference).
                    score = jnp.dot(aug[:, :C], xyz1,
                                    preferred_element_type=jnp.float32,
                                    precision=jax.lax.Precision.HIGHEST)
                    score = score + aug[:, C:C + 1]
                    for p in prev_idx:
                        score = jnp.where(rows == p, _BIG, score)
                    cmin = jnp.min(score, axis=0, keepdims=True)        # [1,TN]
                    cidx = jnp.min(
                        jnp.where(score <= cmin, rows, _IDX_SENTINEL),
                        axis=0, keepdims=True)                          # [1,TN]
                    better = cmin < dmin     # strict <: earlier chunk wins ties
                    return (jnp.where(better, cmin, dmin),
                            jnp.where(better, cidx, imin))

                init = (jnp.full((1, TN), _BIG, jnp.float32),
                        jnp.zeros((1, TN), jnp.float32))
                if n_chunks == 1:
                    return body(0, init)
                return jax.lax.fori_loop(0, n_chunks, body, init)

            d0, i0 = nn_pass(())
            d1, i1 = nn_pass((i0,))
            d2, i2 = nn_pass((i0, i1))

            # 1/d weights (true dist = score + |xyz1|^2), normalised over 3 NN.
            w0 = pl.reciprocal(jnp.maximum(d0 + n1, 1e-10), approx=True)
            w1 = pl.reciprocal(jnp.maximum(d1 + n1, 1e-10), approx=True)
            w2 = pl.reciprocal(jnp.maximum(d2 + n1, 1e-10), approx=True)
            norm = pl.reciprocal(w0 + w1 + w2, approx=True)
            w0 = w0 * norm
            w1 = w1 * norm
            w2 = w2 * norm

            # Sparse one-hot weight matrix (selected rows are disjoint), then
            # interpolation as one lane-dense MXU matmul [D2,S]@[S,TN].
            iota_s = jax.lax.broadcasted_iota(
                jnp.int32, (S, TN), 0).astype(jnp.float32)
            w_mat = jnp.where(iota_s == i2, w2, 0.0)
            w_mat = jnp.where(iota_s == i1, w1, w_mat)
            w_mat = jnp.where(iota_s == i0, w0, w_mat)
            interp = jnp.dot(pts2, w_mat, preferred_element_type=jnp.float32)

        interp_bf = interp.astype(jnp.bfloat16)
        if has_p1:
            p1_bf = p1_ref[0].astype(jnp.bfloat16)                       # [D1,TN]

        # 1x1-conv + folded BN(eval) + ReLU chain; activations stay in VMEM.
        x = None
        cur = 0
        for li in range(num_layers):
            if li == 0 and has_p1:
                wa_ref, wb_ref, ss_ref = layer_refs[cur:cur + 3]
                cur += 3
                # concat([points1, interp]) convolution == two matmuls.
                y = jnp.dot(wa_ref[...], p1_bf,
                            preferred_element_type=jnp.float32)
                y = y + jnp.dot(wb_ref[...], interp_bf,
                                preferred_element_type=jnp.float32)
            else:
                w_ref, ss_ref = layer_refs[cur:cur + 2]
                cur += 2
                inp = interp_bf if li == 0 else x
                y = jnp.dot(w_ref[...], inp, preferred_element_type=jnp.float32)
            y = jnp.maximum(y * ss_ref[:, 0:1] + ss_ref[:, 1:2], 0.0)    # [Co,TN]
            x = y.astype(jnp.bfloat16) if li + 1 < num_layers else y

        out_ref[0] = x.astype(out_ref.dtype)

    return kernel


def _pick_n_tile(n, batch, est_bytes_fn, budget):
    """Largest lane-aligned N tile whose working set fits `budget`; when
    batch == 1 prefer >= 2 grid steps so both v7x TensorCores get work."""
    cands = [t for t in (2048, 1024, 512, 256, 128) if t <= n and n % t == 0]
    if not cands:
        return n                             # small / irregular N: one full tile
    fits = [t for t in cands if est_bytes_fn(t) <= budget] or [cands[-1]]
    if batch == 1:
        multi = [t for t in fits if n // t >= 2]
        if multi:
            return multi[0]
    return fits[0]


# ------------------------------- module wrapper ------------------------------

class PointNetFeaturePropagationPallas:
    """Pallas TPU implementation of GACNet's PointNetFeaturePropagation."""

    _VMEM_BUDGET = 18 * 1024 * 1024    # target per-grid-step working set

    def __init__(self, in_channel, mlp, key):
        self.eps = 1e-5
        self.raw_params = []   # PyTorch-equivalent parameters (for the reference)
        self.layers = []       # (W [Cout,Cin] bf16, scale_shift [Cout,2] f32)
        last = in_channel
        for out_c in mlp:
            key, k1, k2, k3, k4 = jax.random.split(key, 5)
            bound = 1.0 / float(np.sqrt(last))
            w = jax.random.uniform(k1, (out_c, last), jnp.float32, -bound, bound)
            b = jax.random.uniform(k2, (out_c,), jnp.float32, -bound, bound)
            gamma = 1.0 + 0.1 * jax.random.normal(k3, (out_c,), dtype=jnp.float32)
            beta = 0.1 * jax.random.normal(k4, (out_c,), dtype=jnp.float32)
            rm = jnp.zeros((out_c,), jnp.float32)
            rv = jnp.ones((out_c,), jnp.float32)
            self.raw_params.append((w, b, gamma, beta, rm, rv))
            # Hoisted once: fold conv bias + eval-mode BN into a per-channel
            # scale/shift pair and cast the weight to bf16 for the MXU.
            inv_std = 1.0 / jnp.sqrt(rv + self.eps)
            scale = gamma * inv_std
            shift = beta + (b - rm) * scale
            self.layers.append((w.astype(jnp.bfloat16),
                                jnp.stack([scale, shift], axis=1)))   # [Cout,2]
            last = out_c

    def __call__(self, xyz1, xyz2, points1, points2):
        # Channels-first, matching PyTorch: xyz1 [B,C,N], xyz2 [B,C,S],
        # points1 [B,D1,N] or None, points2 [B,D2,S] -> output [B,Cout,N].
        B, C, N = xyz1.shape
        S = xyz2.shape[2]
        D2 = points2.shape[1]
        has_p1 = points1 is not None
        D1 = points1.shape[1] if has_p1 else 0
        num_layers = len(self.layers)
        cout_last = self.layers[-1][0].shape[0]
        cmax = max(w.shape[0] for w, _ in self.layers)
        s_is_one = (S == 1)

        # --- S-aware N tiling under an explicit VMEM budget ------------------
        def est_bytes(tn):
            io = 2 * (C + D1 + cout_last) * tn * 4        # double-buffered tiles
            wmat = 0 if s_is_one else 3 * S * tn * 4      # one-hot weight build
            act = (D2 + 2 * cmax) * tn * 4                # interp + MLP activations
            return io + wmat + act

        TN = _pick_n_tile(N, B, est_bytes, self._VMEM_BUDGET)
        n_tiles = N // TN
        vmem_limit = int(min(max(2 * est_bytes(TN), 32 << 20), 64 << 20))

        # --- host-side prep of the tiny xyz2 side table -----------------------
        # aug[..., :C] = -2*xyz2 (so the cross term is one MXU matmul),
        # aug[..., C]  = |xyz2|^2.  Rows padded up to a chunk multiple get a
        # huge norm so they are never selected as neighbours.
        if s_is_one:
            chunk, n_chunks, s_pad = 1, 1, 1
            aug = jnp.zeros((B, s_pad, C + 1), jnp.float32)
        else:
            target = 8 if TN >= 1024 else (16 if TN >= 512 else 32)
            chunk = min(target, S)
            n_chunks = pl.cdiv(S, chunk)
            s_pad = n_chunks * chunk
            xyz2_t = jnp.transpose(xyz2, (0, 2, 1)).astype(jnp.float32)  # [B,S,C]
            n2 = jnp.sum(xyz2_t * xyz2_t, axis=-1, keepdims=True)        # [B,S,1]
            aug = jnp.concatenate([-2.0 * xyz2_t, n2], axis=-1)          # [B,S,C+1]
            if s_pad != S:
                pad = jnp.zeros((B, s_pad - S, C + 1), jnp.float32)
                pad = pad.at[..., C].set(_BIG)
                aug = jnp.concatenate([aug, pad], axis=1)

        in_specs = [
            pl.BlockSpec((1, C, TN), lambda b, n: (b, 0, n)),
            pl.BlockSpec((1, s_pad, C + 1), lambda b, n: (b, 0, 0)),
            pl.BlockSpec((1, D2, S), lambda b, n: (b, 0, 0)),
        ]
        args = [xyz1, aug, points2]
        if has_p1:
            in_specs.append(pl.BlockSpec((1, D1, TN), lambda b, n: (b, 0, n)))
            args.append(points1)

        for li, (w, ss) in enumerate(self.layers):
            co, ci = w.shape
            if li == 0 and has_p1:
                # Split layer-0 weight so the channel concat becomes two matmuls.
                in_specs += [pl.BlockSpec((co, D1), lambda b, n: (0, 0)),
                             pl.BlockSpec((co, D2), lambda b, n: (0, 0))]
                args += [w[:, :D1], w[:, D1:]]
            else:
                in_specs.append(pl.BlockSpec((co, ci), lambda b, n: (0, 0)))
                args.append(w)
            in_specs.append(pl.BlockSpec((co, 2), lambda b, n: (0, 0)))
            args.append(ss)

        # --- advisory cost estimate for XLA's scheduler -----------------------
        mlp_flops = B * N * sum(2 * w.shape[0] * w.shape[1] for w, _ in self.layers)
        nn_flops = 0 if s_is_one else B * N * (3 * 2 * s_pad * C + 2 * D2 * S)
        bytes_acc = 4 * (xyz1.size + aug.size + points2.size
                         + (points1.size if has_p1 else 0) + B * cout_last * N)
        bytes_acc += sum(2 * w.size + 4 * ss.size for w, ss in self.layers)
        cost = pl.CostEstimate(flops=int(mlp_flops + nn_flops),
                               transcendentals=0 if s_is_one else int(4 * B * N),
                               bytes_accessed=int(bytes_acc))

        kernel = _make_fused_kernel(num_layers, has_p1, s_is_one, chunk, n_chunks)
        return pl.pallas_call(
            kernel,
            out_shape=jax.ShapeDtypeStruct((B, cout_last, N), jnp.float32),
            grid=(B, n_tiles),
            in_specs=in_specs,
            out_specs=pl.BlockSpec((1, cout_last, TN), lambda b, n: (b, 0, n)),
            compiler_params=pltpu.CompilerParams(
                dimension_semantics=("parallel", "parallel"),
                vmem_limit_bytes=vmem_limit),
            cost_estimate=cost,
        )(*args)


# ------------------------------- pure-JAX reference --------------------------

def _ref_forward(xyz1, xyz2, points1, points2, module):
    """Pure-JAX f32 reference following the PyTorch module semantics."""
    x1 = jnp.transpose(xyz1, (0, 2, 1))                      # [B, N, C]
    x2 = jnp.transpose(xyz2, (0, 2, 1))                      # [B, S, C]
    p2 = jnp.transpose(points2, (0, 2, 1))                   # [B, S, D2]
    B, N, _ = x1.shape
    S = x2.shape[1]
    if S == 1:
        interpolated = jnp.broadcast_to(p2, (B, N, p2.shape[-1]))
    else:
        d = (-2.0 * jnp.einsum('bnc,bsc->bns', x1, x2)
             + jnp.sum(x1 ** 2, -1)[..., None]
             + jnp.sum(x2 ** 2, -1)[:, None, :])
        neg_top, idx = jax.lax.top_k(-d, 3)
        dists = jnp.maximum(-neg_top, 1e-10)
        w = 1.0 / dists
        w = w / jnp.sum(w, -1, keepdims=True)
        gathered = jax.vmap(lambda pts, ix: pts[ix])(p2, idx)          # [B,N,3,D2]
        interpolated = jnp.sum(gathered * w[..., None], axis=2)
    if points1 is not None:
        p1 = jnp.transpose(points1, (0, 2, 1))
        x = jnp.concatenate([p1, interpolated], axis=-1)
    else:
        x = interpolated
    for (wgt, b, gamma, beta, rm, rv) in module.raw_params:
        inv_std = 1.0 / jnp.sqrt(rv + module.eps)
        scale = gamma * inv_std
        shift = beta + (b - rm) * scale
        x = jnp.maximum(x @ wgt.T * scale + shift, 0.0)
    return jnp.transpose(x, (0, 2, 1))


if __name__ == "__main__":
    key = jax.random.PRNGKey(0)
    kx1, kx2, kp1, kp2, kparam, kparam2, kbig = jax.random.split(key, 7)

    # Tolerance covers the intentional bf16 MXU matmuls + approx reciprocals.
    tol = dict(rtol=5e-2, atol=5e-2)

    # --- small shapes, path with points1 (fp2/fp3/fp4 in GACNet) ---
    B, C, N, S = 2, 3, 16, 8
    D1, D2 = 4, 6
    mlp = [16, 8]
    xyz1 = jax.random.normal(kx1, (B, C, N), dtype=jnp.float32)
    xyz2 = jax.random.normal(kx2, (B, C, S), dtype=jnp.float32)
    points1 = jax.random.normal(kp1, (B, D1, N), dtype=jnp.float32)
    points2 = jax.random.normal(kp2, (B, D2, S), dtype=jnp.float32)

    module = PointNetFeaturePropagationPallas(D1 + D2, mlp, kparam)
    out = jax.block_until_ready(module(xyz1, xyz2, points1, points2))
    assert out.shape == (B, mlp[-1], N), out.shape
    ref = _ref_forward(xyz1, xyz2, points1, points2, module)
    np.testing.assert_allclose(np.asarray(out), np.asarray(ref), **tol)

    # --- small shapes, path without points1 (fp1 in GACNet) ---
    module2 = PointNetFeaturePropagationPallas(D2, mlp, kparam2)
    out2 = jax.block_until_ready(module2(xyz1, xyz2, None, points2))
    assert out2.shape == (B, mlp[-1], N), out2.shape
    ref2 = _ref_forward(xyz1, xyz2, None, points2, module2)
    np.testing.assert_allclose(np.asarray(out2), np.asarray(ref2), **tol)

    # --- moderate shapes: exercises N tiling, the B==1 two-step rule and the
    #     multi-chunk streaming 3-NN path ---
    kb1, kb2, kb3, kb4, kbp = jax.random.split(kbig, 5)
    Bb, Nb, Sb, D1b, D2b = 1, 256, 64, 8, 16
    mlpb = [32, 16]
    xyz1b = jax.random.normal(kb1, (Bb, C, Nb), dtype=jnp.float32)
    xyz2b = jax.random.normal(kb2, (Bb, C, Sb), dtype=jnp.float32)
    points1b = jax.random.normal(kb3, (Bb, D1b, Nb), dtype=jnp.float32)
    points2b = jax.random.normal(kb4, (Bb, D2b, Sb), dtype=jnp.float32)
    module3 = PointNetFeaturePropagationPallas(D1b + D2b, mlpb, kbp)
    out3 = jax.block_until_ready(module3(xyz1b, xyz2b, points1b, points2b))
    assert out3.shape == (Bb, mlpb[-1], Nb), out3.shape
    ref3 = _ref_forward(xyz1b, xyz2b, points1b, points2b, module3)
    np.testing.assert_allclose(np.asarray(out3), np.asarray(ref3), **tol)

    print("KERNEL_OK")
</pallas_src>

<mosaic_0001>
module attributes {stable_mosaic.version = 11 : i64} {
  func.func @kernel(%arg0: i32, %arg1: i32, %arg2: memref<1x3x16xf32, #tpu.memory_space<vmem>>, %arg3: memref<1x8x4xf32, #tpu.memory_space<vmem>>, %arg4: memref<1x6x8xf32, #tpu.memory_space<vmem>>, %arg5: memref<1x4x16xf32, #tpu.memory_space<vmem>>, %arg6: memref<16x4xbf16, #tpu.memory_space<vmem>>, %arg7: memref<16x6xbf16, #tpu.memory_space<vmem>>, %arg8: memref<16x2xf32, #tpu.memory_space<vmem>>, %arg9: memref<8x16xbf16, #tpu.memory_space<vmem>>, %arg10: memref<8x2xf32, #tpu.memory_space<vmem>>, %arg11: memref<1x8x16xf32, #tpu.memory_space<vmem>>) attributes {dimension_semantics = [#tpu.dimension_semantics<parallel>, #tpu.dimension_semantics<parallel>], iteration_bounds = array<i64: 2, 1>, scalar_prefetch = 0 : i64, scratch_operands = 0 : i64, tpu.core_type = #tpu.core_type<tc>, window_params = [{transform_indices = @transform_0, window_bounds = array<i64: 1, 3, 16>}, {transform_indices = @transform_1, window_bounds = array<i64: 1, 8, 4>}, {transform_indices = @transform_2, window_bounds = array<i64: 1, 6, 8>}, {transform_indices = @transform_3, window_bounds = array<i64: 1, 4, 16>}, {pipeline_mode = #tpu.pipeline_mode<synchronous>, transform_indices = @transform_4, window_bounds = array<i64: 16, 4>}, {pipeline_mode = #tpu.pipeline_mode<synchronous>, transform_indices = @transform_5, window_bounds = array<i64: 16, 6>}, {pipeline_mode = #tpu.pipeline_mode<synchronous>, transform_indices = @transform_6, window_bounds = array<i64: 16, 2>}, {pipeline_mode = #tpu.pipeline_mode<synchronous>, transform_indices = @transform_7, window_bounds = array<i64: 8, 16>}, {pipeline_mode = #tpu.pipeline_mode<synchronous>, transform_indices = @transform_8, window_bounds = array<i64: 8, 2>}, {transform_indices = @transform_9, window_bounds = array<i64: 1, 8, 16>}]} {
    %c0 = arith.constant 0 : index
    %c0_0 = arith.constant 0 : index
    %c0_1 = arith.constant 0 : index
    %0 = vector.load %arg4[%c0, %c0_0, %c0_1] : memref<1x6x8xf32, #tpu.memory_space<vmem>>, vector<1x6x8xf32>
    %1 = vector.shape_cast %0 : vector<1x6x8xf32> to vector<6x8xf32>
    %c0_2 = arith.constant 0 : index
    %c0_3 = arith.constant 0 : index
    %c0_4 = arith.constant 0 : index
    %2 = vector.load %arg2[%c0_2, %c0_3, %c0_4] : memref<1x3x16xf32, #tpu.memory_space<vmem>>, vector<1x3x16xf32>
    %3 = vector.shape_cast %2 : vector<1x3x16xf32> to vector<3x16xf32>
    %4 = vector.extract_strided_slice %3 {offsets = [0, 0], sizes = [1, 16], strides = [1, 1]} : vector<3x16xf32> to vector<1x16xf32>
    %5 = vector.extract_strided_slice %3 {offsets = [0, 0], sizes = [1, 16], strides = [1, 1]} : vector<3x16xf32> to vector<1x16xf32>
    %6 = arith.mulf %4, %5 : vector<1x16xf32>
    %7 = vector.extract_strided_slice %3 {offsets = [1, 0], sizes = [1, 16], strides = [1, 1]} : vector<3x16xf32> to vector<1x16xf32>
    %8 = vector.extract_strided_slice %3 {offsets = [1, 0], sizes = [1, 16], strides = [1, 1]} : vector<3x16xf32> to vector<1x16xf32>
    %9 = arith.mulf %7, %8 : vector<1x16xf32>
    %10 = arith.addf %6, %9 : vector<1x16xf32>
    %11 = vector.extract_strided_slice %3 {offsets = [2, 0], sizes = [1, 16], strides = [1, 1]} : vector<3x16xf32> to vector<1x16xf32>
    %12 = vector.extract_strided_slice %3 {offsets = [2, 0], sizes = [1, 16], strides = [1, 1]} : vector<3x16xf32> to vector<1x16xf32>
    %13 = arith.mulf %11, %12 : vector<1x16xf32>
    %14 = arith.addf %10, %13 : vector<1x16xf32>
    %15 = tpu.iota {dimensions = array<i32: 0>} : vector<8x16xi32>
    %16 = arith.sitofp %15 : vector<8x16xi32> to vector<8x16xf32>
    %cst = arith.constant 1.000000e+30 : f32
    %17 = vector.broadcast %cst : f32 to vector<1x16xf32>
    %cst_5 = arith.constant 0.000000e+00 : f32
    %18 = vector.broadcast %cst_5 : f32 to vector<1x16xf32>
    %c0_6 = arith.constant 0 : index
    %c0_7 = arith.constant 0 : index
    %c0_8 = arith.constant 0 : index
    %19 = vector.load %arg3[%c0_6, %c0_7, %c0_8] : memref<1x8x4xf32, #tpu.memory_space<vmem>>, vector<1x8x4xf32>
    %20 = vector.shape_cast %19 : vector<1x8x4xf32> to vector<8x4xf32>
    %21 = vector.extract_strided_slice %20 {offsets = [0, 0], sizes = [8, 3], strides = [1, 1]} : vector<8x4xf32> to vector<8x3xf32>
    %cst_9 = arith.constant dense<0.000000e+00> : vector<8x16xf32>
    %22 = tpu.matmul %21, %3, %cst_9 {dimension_numbers = #tpu.dot_dimension_numbers<[1], [0], [0], [1], [0, 0, 1, 1], [], []>, precision = #tpu.contract_precision<fp32>} : vector<8x3xf32>, vector<3x16xf32>, vector<8x16xf32> -> vector<8x16xf32>
    %23 = vector.extract_strided_slice %20 {offsets = [0, 3], sizes = [8, 1], strides = [1, 1]} : vector<8x4xf32> to vector<8x1xf32>
    %24 = vector.broadcast %23 : vector<8x1xf32> to vector<8x16xf32>
    %25 = arith.addf %22, %24 : vector<8x16xf32>
    %cst_10 = arith.constant dense<0x7F800000> : vector<16xf32>
    %26 = vector.multi_reduction <minimumf>, %25, %cst_10 [0] : vector<8x16xf32> to vector<16xf32>
    %27 = vector.shape_cast %26 : vector<16xf32> to vector<1x16xf32>
    %28 = vector.broadcast %27 : vector<1x16xf32> to vector<8x16xf32>
    %29 = arith.cmpf ole, %25, %28 : vector<8x16xf32>
    %cst_11 = arith.constant 1.000000e+09 : f32
    %30 = vector.broadcast %cst_11 : f32 to vector<8x16xf32>
    %31 = arith.select %29, %16, %30 : vector<8x16xi1>, vector<8x16xf32>
    %cst_12 = arith.constant dense<0x7F800000> : vector<16xf32>
    %32 = vector.multi_reduction <minimumf>, %31, %cst_12 [0] : vector<8x16xf32> to vector<16xf32>
    %33 = vector.shape_cast %32 : vector<16xf32> to vector<1x16xf32>
    %34 = arith.cmpf olt, %27, %17 : vector<1x16xf32>
    %35 = arith.select %34, %27, %17 : vector<1x16xi1>, vector<1x16xf32>
    %36 = arith.select %34, %33, %18 : vector<1x16xi1>, vector<1x16xf32>
    %cst_13 = arith.constant 1.000000e+30 : f32
    %37 = vector.broadcast %cst_13 : f32 to vector<1x16xf32>
    %cst_14 = arith.constant 0.000000e+00 : f32
    %38 = vector.broadcast %cst_14 : f32 to vector<1x16xf32>
    %c0_15 = arith.constant 0 : index
    %c0_16 = arith.constant 0 : index
    %c0_17 = arith.constant 0 : index
    %39 = vector.load %arg3[%c0_15, %c0_16, %c0_17] : memref<1x8x4xf32, #tpu.memory_space<vmem>>, vector<1x8x4xf32>
    %40 = vector.shape_cast %39 : vector<1x8x4xf32> to vector<8x4xf32>
    %41 = vector.extract_strided_slice %40 {offsets = [0, 0], sizes = [8, 3], strides = [1, 1]} : vector<8x4xf32> to vector<8x3xf32>
    %cst_18 = arith.constant dense<0.000000e+00> : vector<8x16xf32>
    %42 = tpu.matmul %41, %3, %cst_18 {dimension_numbers = #tpu.dot_dimension_numbers<[1], [0], [0], [1], [0, 0, 1, 1], [], []>, precision = #tpu.contract_precision<fp32>} : vector<8x3xf32>, vector<3x16xf32>, vector<8x16xf32> -> vector<8x16xf32>
    %43 = vector.extract_strided_slice %40 {offsets = [0, 3], sizes = [8, 1], strides = [1, 1]} : vector<8x4xf32> to vector<8x1xf32>
    %44 = vector.broadcast %43 : vector<8x1xf32> to vector<8x16xf32>
    %45 = arith.addf %42, %44 : vector<8x16xf32>
    %46 = vector.broadcast %36 : vector<1x16xf32> to vector<8x16xf32>
    %47 = arith.cmpf oeq, %16, %46 : vector<8x16xf32>
    %cst_19 = arith.constant 1.000000e+30 : f32
    %48 = vector.broadcast %cst_19 : f32 to vector<8x16xf32>
    %49 = arith.select %47, %48, %45 : vector<8x16xi1>, vector<8x16xf32>
    %cst_20 = arith.constant dense<0x7F800000> : vector<16xf32>
    %50 = vector.multi_reduction <minimumf>, %49, %cst_20 [0] : vector<8x16xf32> to vector<16xf32>
    %51 = vector.shape_cast %50 : vector<16xf32> to vector<1x16xf32>
    %52 = vector.broadcast %51 : vector<1x16xf32> to vector<8x16xf32>
    %53 = arith.cmpf ole, %49, %52 : vector<8x16xf32>
    %cst_21 = arith.constant 1.000000e+09 : f32
    %54 = vector.broadcast %cst_21 : f32 to vector<8x16xf32>
    %55 = arith.select %53, %16, %54 : vector<8x16xi1>, vector<8x16xf32>
    %cst_22 = arith.constant dense<0x7F800000> : vector<16xf32>
    %56 = vector.multi_reduction <minimumf>, %55, %cst_22 [0] : vector<8x16xf32> to vector<16xf32>
    %57 = vector.shape_cast %56 : vector<16xf32> to vector<1x16xf32>
    %58 = arith.cmpf olt, %51, %37 : vector<1x16xf32>
    %59 = arith.select %58, %51, %37 : vector<1x16xi1>, vector<1x16xf32>
    %60 = arith.select %58, %57, %38 : vector<1x16xi1>, vector<1x16xf32>
    %cst_23 = arith.constant 1.000000e+30 : f32
    %61 = vector.broadcast %cst_23 : f32 to vector<1x16xf32>
    %cst_24 = arith.constant 0.000000e+00 : f32
    %62 = vector.broadcast %cst_24 : f32 to vector<1x16xf32>
    %c0_25 = arith.constant 0 : index
    %c0_26 = arith.constant 0 : index
    %c0_27 = arith.constant 0 : index
    %63 = vector.load %arg3[%c0_25, %c0_26, %c0_27] : memref<1x8x4xf32, #tpu.memory_space<vmem>>, vector<1x8x4xf32>
    %64 = vector.shape_cast %63 : vector<1x8x4xf32> to vector<8x4xf32>
    %65 = vector.extract_strided_slice %64 {offsets = [0, 0], sizes = [8, 3], strides = [1, 1]} : vector<8x4xf32> to vector<8x3xf32>
    %cst_28 = arith.constant dense<0.000000e+00> : vector<8x16xf32>
    %66 = tpu.matmul %65, %3, %cst_28 {dimension_numbers = #tpu.dot_dimension_numbers<[1], [0], [0], [1], [0, 0, 1, 1], [], []>, precision = #tpu.contract_precision<fp32>} : vector<8x3xf32>, vector<3x16xf32>, vector<8x16xf32> -> vector<8x16xf32>
    %67 = vector.extract_strided_slice %64 {offsets = [0, 3], sizes = [8, 1], strides = [1, 1]} : vector<8x4xf32> to vector<8x1xf32>
    %68 = vector.broadcast %67 : vector<8x1xf32> to vector<8x16xf32>
    %69 = arith.addf %66, %68 : vector<8x16xf32>
    %70 = vector.broadcast %36 : vector<1x16xf32> to vector<8x16xf32>
    %71 = arith.cmpf oeq, %16, %70 : vector<8x16xf32>
    %cst_29 = arith.constant 1.000000e+30 : f32
    %72 = vector.broadcast %cst_29 : f32 to vector<8x16xf32>
    %73 = arith.select %71, %72, %69 : vector<8x16xi1>, vector<8x16xf32>
    %74 = vector.broadcast %60 : vector<1x16xf32> to vector<8x16xf32>
    %75 = arith.cmpf oeq, %16, %74 : vector<8x16xf32>
    %cst_30 = arith.constant 1.000000e+30 : f32
    %76 = vector.broadcast %cst_30 : f32 to vector<8x16xf32>
    %77 = arith.select %75, %76, %73 : vector<8x16xi1>, vector<8x16xf32>
    %cst_31 = arith.constant dense<0x7F800000> : vector<16xf32>
    %78 = vector.multi_reduction <minimumf>, %77, %cst_31 [0] : vector<8x16xf32> to vector<16xf32>
    %79 = vector.shape_cast %78 : vector<16xf32> to vector<1x16xf32>
    %80 = vector.broadcast %79 : vector<1x16xf32> to vector<8x16xf32>
    %81 = arith.cmpf ole, %77, %80 : vector<8x16xf32>
    %cst_32 = arith.constant 1.000000e+09 : f32
    %82 = vector.broadcast %cst_32 : f32 to vector<8x16xf32>
    %83 = arith.select %81, %16, %82 : vector<8x16xi1>, vector<8x16xf32>
    %cst_33 = arith.constant dense<0x7F800000> : vector<16xf32>
    %84 = vector.multi_reduction <minimumf>, %83, %cst_33 [0] : vector<8x16xf32> to vector<16xf32>
    %85 = vector.shape_cast %84 : vector<16xf32> to vector<1x16xf32>
    %86 = arith.cmpf olt, %79, %61 : vector<1x16xf32>
    %87 = arith.select %86, %79, %61 : vector<1x16xi1>, vector<1x16xf32>
    %88 = arith.select %86, %85, %62 : vector<1x16xi1>, vector<1x16xf32>
    %89 = arith.addf %35, %14 : vector<1x16xf32>
    %cst_34 = arith.constant 1.000000e-10 : f32
    %90 = vector.broadcast %cst_34 : f32 to vector<1x16xf32>
    %91 = arith.maximumf %89, %90 : vector<1x16xf32>
    %92 = tpu.reciprocal %91 {approx = true} : vector<1x16xf32> -> vector<1x16xf32>
    %93 = arith.addf %59, %14 : vector<1x16xf32>
    %cst_35 = arith.constant 1.000000e-10 : f32
    %94 = vector.broadcast %cst_35 : f32 to vector<1x16xf32>
    %95 = arith.maximumf %93, %94 : vector<1x16xf32>
    %96 = tpu.reciprocal %95 {approx = true} : vector<1x16xf32> -> vector<1x16xf32>
    %97 = arith.addf %87, %14 : vector<1x16xf32>
    %cst_36 = arith.constant 1.000000e-10 : f32
    %98 = vector.broadcast %cst_36 : f32 to vector<1x16xf32>
    %99 = arith.maximumf %97, %98 : vector<1x16xf32>
    %100 = tpu.reciprocal %99 {approx = true} : vector<1x16xf32> -> vector<1x16xf32>
    %101 = arith.addf %92, %96 : vector<1x16xf32>
    %102 = arith.addf %101, %100 : vector<1x16xf32>
    %103 = tpu.reciprocal %102 {approx = true} : vector<1x16xf32> -> vector<1x16xf32>
    %104 = arith.mulf %92, %103 : vector<1x16xf32>
    %105 = arith.mulf %96, %103 : vector<1x16xf32>
    %106 = arith.mulf %100, %103 : vector<1x16xf32>
    %107 = tpu.iota {dimensions = array<i32: 0>} : vector<8x16xi32>
    %108 = arith.sitofp %107 : vector<8x16xi32> to vector<8x16xf32>
    %109 = vector.broadcast %88 : vector<1x16xf32> to vector<8x16xf32>
    %110 = arith.cmpf oeq, %108, %109 : vector<8x16xf32>
    %cst_37 = arith.constant 0.000000e+00 : f32
    %111 = vector.shape_cast %106 : vector<1x16xf32> to vector<1x16xf32>
    %112 = vector.broadcast %111 : vector<1x16xf32> to vector<8x16xf32>
    %113 = vector.broadcast %cst_37 : f32 to vector<8x16xf32>
    %114 = arith.select %110, %112, %113 : vector<8x16xi1>, vector<8x16xf32>
    %115 = vector.broadcast %60 : vector<1x16xf32> to vector<8x16xf32>
    %116 = arith.cmpf oeq, %108, %115 : vector<8x16xf32>
    %117 = vector.shape_cast %105 : vector<1x16xf32> to vector<1x16xf32>
    %118 = vector.broadcast %117 : vector<1x16xf32> to vector<8x16xf32>
    %119 = arith.select %116, %118, %114 : vector<8x16xi1>, vector<8x16xf32>
    %120 = vector.broadcast %36 : vector<1x16xf32> to vector<8x16xf32>
    %121 = arith.cmpf oeq, %108, %120 : vector<8x16xf32>
    %122 = vector.shape_cast %104 : vector<1x16xf32> to vector<1x16xf32>
    %123 = vector.broadcast %122 : vector<1x16xf32> to vector<8x16xf32>
    %124 = arith.select %121, %123, %119 : vector<8x16xi1>, vector<8x16xf32>
    %cst_38 = arith.constant dense<0.000000e+00> : vector<6x16xf32>
    %125 = tpu.matmul %1, %124, %cst_38 {dimension_numbers = #tpu.dot_dimension_numbers<[1], [0], [0], [1], [0, 0, 1, 1], [], []>} : vector<6x8xf32>, vector<8x16xf32>, vector<6x16xf32> -> vector<6x16xf32>
    %126 = arith.truncf %125 : vector<6x16xf32> to vector<6x16xbf16>
    %c0_39 = arith.constant 0 : index
    %c0_40 = arith.constant 0 : index
    %c0_41 = arith.constant 0 : index
    %127 = vector.load %arg5[%c0_39, %c0_40, %c0_41] : memref<1x4x16xf32, #tpu.memory_space<vmem>>, vector<1x4x16xf32>
    %128 = vector.shape_cast %127 : vector<1x4x16xf32> to vector<4x16xf32>
    %129 = arith.truncf %128 : vector<4x16xf32> to vector<4x16xbf16>
    %c0_42 = arith.constant 0 : index
    %c0_43 = arith.constant 0 : index
    %130 = vector.load %arg6[%c0_42, %c0_43] : memref<16x4xbf16, #tpu.memory_space<vmem>>, vector<16x4xbf16>
    %cst_44 = arith.constant dense<0.000000e+00> : vector<16x16xf32>
    %131 = tpu.matmul %130, %129, %cst_44 {dimension_numbers = #tpu.dot_dimension_numbers<[1], [0], [0], [1], [0, 0, 1, 1], [], []>} : vector<16x4xbf16>, vector<4x16xbf16>, vector<16x16xf32> -> vector<16x16xf32>
    %c0_45 = arith.constant 0 : index
    %c0_46 = arith.constant 0 : index
    %132 = vector.load %arg7[%c0_45, %c0_46] : memref<16x6xbf16, #tpu.memory_space<vmem>>, vector<16x6xbf16>
    %cst_47 = arith.constant dense<0.000000e+00> : vector<16x16xf32>
    %133 = tpu.matmul %132, %126, %cst_47 {dimension_numbers = #tpu.dot_dimension_numbers<[1], [0], [0], [1], [0, 0, 1, 1], [], []>} : vector<16x6xbf16>, vector<6x16xbf16>, vector<16x16xf32> -> vector<16x16xf32>
    %134 = arith.addf %131, %133 : vector<16x16xf32>
    %c0_48 = arith.constant 0 : index
    %c0_49 = arith.constant 0 : index
    %135 = vector.load %arg8[%c0_48, %c0_49] : memref<16x2xf32, #tpu.memory_space<vmem>>, vector<16x1xf32>
    %136 = vector.broadcast %135 : vector<16x1xf32> to vector<16x16xf32>
    %137 = arith.mulf %134, %136 : vector<16x16xf32>
    %c0_50 = arith.constant 0 : index
    %c1 = arith.constant 1 : index
    %138 = vector.load %arg8[%c0_50, %c1] : memref<16x2xf32, #tpu.memory_space<vmem>>, vector<16x1xf32>
    %139 = vector.broadcast %138 : vector<16x1xf32> to vector<16x16xf32>
    %140 = arith.addf %137, %139 : vector<16x16xf32>
    %cst_51 = arith.constant 0.000000e+00 : f32
    %141 = vector.broadcast %cst_51 : f32 to vector<16x16xf32>
    %142 = arith.maximumf %140, %141 : vector<16x16xf32>
    %143 = arith.truncf %142 : vector<16x16xf32> to vector<16x16xbf16>
    %c0_52 = arith.constant 0 : index
    %c0_53 = arith.constant 0 : index
    %144 = vector.load %arg9[%c0_52, %c0_53] : memref<8x16xbf16, #tpu.memory_space<vmem>>, vector<8x16xbf16>
    %cst_54 = arith.constant dense<0.000000e+00> : vector<8x16xf32>
    %145 = tpu.matmul %144, %143, %cst_54 {dimension_numbers = #tpu.dot_dimension_numbers<[1], [0], [0], [1], [0, 0, 1, 1], [], []>} : vector<8x16xbf16>, vector<16x16xbf16>, vector<8x16xf32> -> vector<8x16xf32>
    %c0_55 = arith.constant 0 : index
    %c0_56 = arith.constant 0 : index
    %146 = vector.load %arg10[%c0_55, %c0_56] : memref<8x2xf32, #tpu.memory_space<vmem>>, vector<8x1xf32>
    %147 = vector.broadcast %146 : vector<8x1xf32> to vector<8x16xf32>
    %148 = arith.mulf %145, %147 : vector<8x16xf32>
    %c0_57 = arith.constant 0 : index
    %c1_58 = arith.constant 1 : index
    %149 = vector.load %arg10[%c0_57, %c1_58] : memref<8x2xf32, #tpu.memory_space<vmem>>, vector<8x1xf32>
    %150 = vector.broadcast %149 : vector<8x1xf32> to vector<8x16xf32>
    %151 = arith.addf %148, %150 : vector<8x16xf32>
    %cst_59 = arith.constant 0.000000e+00 : f32
    %152 = vector.broadcast %cst_59 : f32 to vector<8x16xf32>
    %153 = arith.maximumf %151, %152 : vector<8x16xf32>
    %c0_60 = arith.constant 0 : index
    %c0_61 = arith.constant 0 : index
    %c0_62 = arith.constant 0 : index
    %154 = vector.load %arg11[%c0_60, %c0_61, %c0_62] : memref<1x8x16xf32, #tpu.memory_space<vmem>>, vector<1x8x16xf32>
    %155 = vector.shape_cast %154 : vector<1x8x16xf32> to vector<8x16xf32>
    %156 = vector.shape_cast %153 : vector<8x16xf32> to vector<1x8x16xf32>
    tpu.vector_store %arg11[%c0_60, %c0_61, %c0_62], %156 {strides = array<i32>} : memref<1x8x16xf32, #tpu.memory_space<vmem>>, vector<1x8x16xf32>,
    return
  }
  func.func @transform_0(%arg0: i32, %arg1: i32) -> (i32, i32, i32) {
    %c0_i32 = arith.constant 0 : i32
    %c0_i32_0 = arith.constant 0 : i32
    return %arg0, %c0_i32, %arg1 : i32, i32, i32
  }
  func.func @transform_1(%arg0: i32, %arg1: i32) -> (i32, i32, i32) {
    %c0_i32 = arith.constant 0 : i32
    %c0_i32_0 = arith.constant 0 : i32
    %c0_i32_1 = arith.constant 0 : i32
    return %arg0, %c0_i32, %c0_i32_0 : i32, i32, i32
  }
  func.func @transform_2(%arg0: i32, %arg1: i32) -> (i32, i32, i32) {
    %c0_i32 = arith.constant 0 : i32
    %c0_i32_0 = arith.constant 0 : i32
    %c0_i32_1 = arith.constant 0 : i32
    return %arg0, %c0_i32, %c0_i32_0 : i32, i32, i32
  }
  func.func @transform_3(%arg0: i32, %arg1: i32) -> (i32, i32, i32) {
    %c0_i32 = arith.constant 0 : i32
    %c0_i32_0 = arith.constant 0 : i32
    return %arg0, %c0_i32, %arg1 : i32, i32, i32
  }
  func.func @transform_4(%arg0: i32, %arg1: i32) -> (i32, i32) {
    %c0_i32 = arith.constant 0 : i32
    %c0_i32_0 = arith.constant 0 : i32
    %c0_i32_1 = arith.constant 0 : i32
    return %c0_i32, %c0_i32_0 : i32, i32
  }
  func.func @transform_5(%arg0: i32, %arg1: i32) -> (i32, i32) {
    %c0_i32 = arith.constant 0 : i32
    %c0_i32_0 = arith.constant 0 : i32
    %c0_i32_1 = arith.constant 0 : i32
    return %c0_i32, %c0_i32_0 : i32, i32
  }
  func.func @transform_6(%arg0: i32, %arg1: i32) -> (i32, i32) {
    %c0_i32 = arith.constant 0 : i32
    %c0_i32_0 = arith.constant 0 : i32
    %c0_i32_1 = arith.constant 0 : i32
    return %c0_i32, %c0_i32_0 : i32, i32
  }
  func.func @transform_7(%arg0: i32, %arg1: i32) -> (i32, i32) {
    %c0_i32 = arith.constant 0 : i32
    %c0_i32_0 = arith.constant 0 : i32
    %c0_i32_1 = arith.constant 0 : i32
    return %c0_i32, %c0_i32_0 : i32, i32
  }
  func.func @transform_8(%arg0: i32, %arg1: i32) -> (i32, i32) {
    %c0_i32 = arith.constant 0 : i32
    %c0_i32_0 = arith.constant 0 : i32
    %c0_i32_1 = arith.constant 0 : i32
    return %c0_i32, %c0_i32_0 : i32, i32
  }
  func.func @transform_9(%arg0: i32, %arg1: i32) -> (i32, i32, i32) {
    %c0_i32 = arith.constant 0 : i32
    %c0_i32_0 = arith.constant 0 : i32
    return %arg0, %c0_i32, %arg1 : i32, i32, i32
  }
}

</mosaic_0001>

<bundles_post_ra>
// kernel: tpu_custom_call.1
= control target key start
LH: loop header
LB: loop body
LE: loop exit
PB: predicated region body
PF: predicated region fallthrough
CT: control target
= control target key end

     0   :  { %14 = vsyncpa [#allocation3], 0  ;;  %s1351_s0 = inlined_call_operand.vmem [shape: f32[2,3,16], index: 0, kind: input, shape index: {}]   ;;  %s1352_s1 = inlined_call_operand.vmem [shape: f32[2,8,4], index: 1, kind: input, shape index: {}]   ;;  %s1353_s2 = inlined_call_operand.vmem [shape: f32[2,6,8], index: 2, kind: input, shape index: {}]   ;;  %s1354_s3 = inlined_call_operand.vmem [shape: f32[2,4,16], index: 3, kind: input, shape index: {}]   ;;  %s1355_s4 = inlined_call_operand.vmem [shape: bf16[16,4], index: 4, kind: input, shape index: {}]   ;;  %s1356_s5 = inlined_call_operand.vmem [shape: bf16[16,6], index: 5, kind: input, shape index: {}]   ;;  %s1357_s6 = inlined_call_operand.vmem [shape: f32[16,2], index: 6, kind: input, shape index: {}]   ;;  %s1358_s7 = inlined_call_operand.vmem [shape: bf16[8,16], index: 7, kind: input, shape index: {}]   ;;  %s1359_s8 = inlined_call_operand.vmem [shape: f32[8,2], index: 8, kind: input, shape index: {}]   ;;  %s1360_s9 = inlined_call_operand.hbm [shape: f32[2,8,16], index: 9, kind: output, shape index: {}]  }
   0x1   :  { %16 = vsyncpa [#allocation3 + $0x1], 0  ;;  %s1175_s30 = smov 0   ;;  %s1177_s10 = smov 0  }
   0x2   :  { %s1179_s11 = smov 0   ;;  %s1181_s12 = smov 0  }
   0x3   :  { %s1183_s13 = smov 0   ;;  %s1185_s14 = smov 0  }
   0x4 LB: > { %s941_s15 = sadd.s32 4294967295, %s1120_s14   ;;  %s942_s16 = sadd.s32 4294967294, %s1120_s14   ;;  %s1120_s14 = sphi %s1185_s14, %s22_s14   ;;  %s1116_s13 = sphi %s1183_s13, %s1367_s13   ;;  %s1112_s12 = sphi %s1181_s12, %s1366_s12   ;;  %s1108_s11 = sphi %s1179_s11, %s1365_s11   ;;  %s1104_s10 = sphi %s1177_s10, %s1364_s10   ;;  %s1100_s30 = sphi %s1175_s30, %s1363_s30  }
   0x5   : > { %s34_s17 = sadd.s32 1, %s1116_s13  ;;  %s256_s18 = sadd.s32 1, %s1108_s11 }
   0x6   : > { %p36_p0 = scmp.ge.s32.totalorder %s34_s17, 2  ;;  %p266_p1 = scmp.ne.s32.totalorder %s1108_s11, %s1104_s10 }
   0x7   : > { %p267_p2 = scmp.eq.s32.totalorder %s941_s15, 1  ;;  %p272_p3 = scmp.ne.s32.totalorder %s1104_s10, %s1100_s30 }
   0x8   : > { %s1369_s17 = smov (%p36_p0, %s34_s17), 0  ;;  %p273_p5 = scmp.eq.s32.totalorder %s942_s16, 1 }
   0x9   : > { %p1215_p4 = por %p267_p2, %p266_p1  ;;  %s251_s20 = ssub.s32 %s1116_s13, %s1369_s17 }
   0xa   : > { %p945_p6 = scmp.ge.s32.totalorder %s1120_s14, 1  ;;  %p254_p7 = scmp.eq.s32.totalorder %s251_s20, 0 }
   0xb   : > { %p1222_p8 = por %p273_p5, %p272_p3  ;;  %p340_p9 = scmp.lt.s32.totalorder %s1120_s14, 3 }
   0xc   : > { %s1228_s22 = scalar_select %p254_p7, %s1108_s11, %s256_s18  }
   0xd   : > { %p341_p10 = pnand %p945_p6, %p340_p9 }
   0xe   : > { %p393_p11 = scmp.lt.s32.totalorder (!%p341_p10), %s1112_s12, 1  ;;  %s390_s15 = sand.u32 (!%p341_p10), 1, %s1104_s10  }
   0xf   : > { %344 = sbr.rel (%p341_p10) target bundleno = 717 (0x2cd), region = 56  ;;  %s964_s18 = sshll.u32 (!%p341_p10), %s1112_s12, 3 }
  0x14   : > { %v1122_v0 = vmov 3   ;;  %s1232_s23 = scalar_select %p393_p11, %s1112_s12, 1  ;;  %vm438_vm0 = vcmask 1042432   ;;  %vm435_vm1 = vcmask 23552   ;;  %vm588_vm2 = vcmask 130048  }
  0x15   : > { %1027 = vset.pattern.permute.xlu0 %v1122_v0  ;;  %v426_v30 = vlaneseq  ;;  %vm672_vm12 = vcmask 64512   ;;  %vm738_vm13 = vcmask 1041408   ;;  %vm734_vm14 = vcmask 31744   ;;  %s815_s12 = scalar_lea.sflag [#allocation3], %s390_s15 }
  0x16   : > { %s947_s24 = sshll.u32 %s1232_s23, 2  ;;  %s948_s25 = sshll.u32 %s1232_s23, 3  ;;  %vm708_vm15 = vcmask 48128  }
  0x17   : > { %s399_s28 = scalar_lea.vmem %s1351_s0, %s947_s24  ;;  %s403_s16 = scalar_lea.vmem %s1352_s1, %s948_s25  ;;  %v427_v33 = vshrl.u32 %v426_v30, 7 }
  0x18   : > { %v1246_v1 = vld [vmem:[%s399_s28] sm:$0x7]  ;;  %s407_s26 = scalar_lea.vmem %s1353_s2, %s948_s25  ;;  %s414_s25 = scalar_lea.vmem %s1354_s3, %s947_s24 }
  0x19   : > { %v429_v2 = vld [vmem:[%s403_s16] sm:$0xff]  ;;  %v440_v3 = vsel %vm438_vm0, %v1246_v1, 0  ;;  %v1251_v36 = vcvt.s32.f32 %v427_v33  ;;  %v418_v61 = vmul.f32 %v1246_v1, %v1246_v1  ;;  %s946_s16 = sshll.u32 %s390_s15, 3  ;;  %s826_s24 = scalar_lea.hbm %s1360_s9, %s964_s18 }
  0x1a   : > { %v436_v4 = vsel %vm435_vm1, %v429_v2, 0  ;;  %432 = vperm.xlu0 %1027, %v429_v2   ;;  %v457_v5 = vand.u32 4294901760, %v440_v3  ;;  %s830_s28 = sshll.u32 %s826_s24, 4  ;;  %s831_s28 = int_to_ptr.hbm [resolvable:$true] %s830_s28 }
  0x1b   : > { %v459_v6 = vand.u32 4294901760, %v436_v4  ;;  %v420_v0 = vrot.slane %v418_v61, 1 }
  0x1c   : > { %458 = vmatpush.msra.mxu2 %v457_v5  ;;  %v484_v8 = vsub.f32 %v440_v3, %v457_v5  ;;  %534 = vmatpush.msra.mxu3 %v457_v5 }
  0x1d   : > { %v460_v7 = vsub.f32 %v436_v4, %v459_v6 }
  0x1e   : > { %v485_v10 = vand.u32 4294901760, %v484_v8  ;;  %511 = vmatpush.msrb.mxu2 %v484_v8 }
  0x1f   : > { %v461_v9 = vand.u32 4294901760, %v460_v7 }
  0x20   : > { %v486_v12 = vsub.f32 %v484_v8, %v485_v10  ;;  %560 = vmatpush.msra.mxu0 %v485_v10 }
  0x21   : > { %v462_v11 = vsub.f32 %v460_v7, %v461_v9  ;;  %538 = vmatmul.f32.vlgmr.msra.gmra.mxu3 %v461_v9  ;;  %562 = vmatmul.f32.vlgmr.msra.gmra.mxu0 %v459_v6 }
  0x22   : > { %v487_v14 = vand.u32 4294901760, %v486_v12 }
  0x23   : > { %v463_v13 = vand.u32 4294901760, %v462_v11 }
  0x24   : > { %488 = vmatpush.msra.mxu1 %v487_v14 }
  0x25   : > { %464 = vmatmul.f32.vlgmr.msra.gmra.mxu2 %v463_v13  ;;  %490 = vmatmul.f32.vlgmr.msra.gmra.mxu1 %v459_v6 }
  0x26   : > { %582 = vmatpush.msrb.mxu1 %v457_v5  ;;  %v422_v5 = vadd.f32 %v420_v0, %v418_v61 }
  0x2d   : > { %514 = vmatmul.f32.vlgmr.msrb.gmra.mxu2 %v460_v7  ;;  %584 = vmatmul.f32.vlgmr.msrb.gmra.mxu1 %v459_v6  ;;  %v423_v6 = vrot.slane %v418_v61, 2 }
  0x2f   : > { %v425_v10 = vadd.f32 %v423_v6, %v422_v5 }
  0x8c   : > { %v433_v15 = vpop.permute.xlu0 %432 }
  0x9e   : > { %v563_v23 = vpop.f32.mrf.mxu0 }
  0xa2   : > { %v491_v18 = vpop.f32.mrf.mxu1 }
  0xa4   : > { %v539_v21 = vpop.f32.mrf.mxu3 }
  0xa8   : > { %v465_v16 = vpop.f32.mrf.mxu2 }
  0xa9   : > { %v466_v17 = vadd.f32 %v465_v16, %v433_v15 }
  0xaa   : > { %v585_v25 = vpop.f32.mrf.mxu1 }
  0xab   : > { %v492_v19 = vadd.f32 %v491_v18, %v466_v17 }
  0xb0   : > { %v515_v20 = vpop.f32.mrf.mxu2 }
  0xb1   : > { %v516_v22 = vadd.f32 %v515_v20, %v492_v19 }
  0xb3   : > { %v540_v24 = vadd.f32 %v539_v21, %v516_v22 }
  0xb5   : > { %v564_v26 = vadd.f32 %v563_v23, %v540_v24 }
  0xb7   : > { %v586_v27 = vadd.f32 %v585_v25, %v564_v26 }
  0xb9   : > { %v589_v28 = vsel %vm588_vm2, %v586_v27, inf }
  0xba   : > { %v590_v29 = vrot.slane %v589_v28, 4 }
  0xbc   : > { %v591_v31 = vmin.f32 %v589_v28, %v590_v29 }
  0xbe   : > { %v592_v32 = vrot.slane %v591_v31, 2 }
  0xc0   : > { %v593_v34 = vmin.f32 %v591_v31, %v592_v32 }
  0xc2   : > { %v594_v35 = vrot.slane %v593_v34, 1 }
  0xc4   : > { %v595_v37 = vmin.f32 %v593_v34, %v594_v35 }
  0xc6   : > { %vm596_vm3 = vcmp.le.f32.partialorder %v586_v27, %v595_v37  ;;  %vm605_vm4 = vcmp.lt.f32.partialorder %v595_v37, 1e+30 }
  0xc7   : > { %v597_v38 = vsel %vm596_vm3, %v1251_v36, 1e+09  ;;  %v606_v1 = vsel %vm605_vm4, %v595_v37, 1e+30 }
  0xc8   : > { %v598_v39 = vsel %vm588_vm2, %v597_v38, inf  ;;  %v650_v15 = vadd.f32 %v606_v1, %v425_v10 }
  0xc9   : > { %v599_v40 = vrot.slane %v598_v39, 4 }
  0xca   : > { %v651_v18 = vmax.f32 %v650_v15, 1e-10 }
  0xcb   : > { %v600_v41 = vmin.f32 %v598_v39, %v599_v40 }
  0xcd   : > { %v601_v42 = vrot.slane %v600_v41, 2 }
  0xcf   : > { %v602_v43 = vmin.f32 %v600_v41, %v601_v42 }
  0xd1   : > { %v603_v44 = vrot.slane %v602_v43, 1 }
  0xd3   : > { %v604_v45 = vmin.f32 %v602_v43, %v603_v44 }
  0xd5   : > { %v1256_v46 = vsel %vm605_vm4, %v604_v45, 0.0 }
  0xd6   : > { %vm608_vm5 = vcmp.eq.f32.partialorder %v1251_v36, %v1256_v46  ;;  %v756_v46 = vld [vmem:[%s1357_s6] sm:$0xff] }
  0xd7   : > { %v609_v47 = vsel %vm608_vm5, 1e+30, %v586_v27 }
  0xd8   : > { %v610_v48 = vsel %vm588_vm2, %v609_v47, inf }
  0xd9   : > { %v611_v49 = vrot.slane %v610_v48, 4 }
  0xdb   : > { %v612_v50 = vmin.f32 %v610_v48, %v611_v49  ;;  %v697_v49 = vld [vmem:[%s414_s25] sm:$0xf]  ;;  %s1056_s25 = sshra.s32 %s831_s28, 4  ;;  %s1057_s25 = int_to_ptr.hbm [resolvable:$true] %s1056_s25 }
  0xdc   : > { %s1058_s29 = scalar_lea.hbm %s1057_s25, 8  ;;  %p1063_p1 = scmp.lt.s32.totalorder %s1057_s25, %s1360_s9 }
  0xdd   : > { %v613_v51 = vrot.slane %v612_v50, 2  ;;  %p1059_p12 = scmp.ne.s32.totalorder %s1057_s25, %s1058_s29 }
  0xdf   : > { %v614_v52 = vmin.f32 %v612_v50, %v613_v51  ;;  %v698_v50 = vpack.c.bf16 %v697_v49, %v697_v49  ;;  %p1060_p13 = pnand %p1059_p12, %p1215_p4 }
  0xe1   : > { %v615_v53 = vrot.slane %v614_v52, 1  ;;  %v740_v51 = vsel %vm738_vm13, %v698_v50, 0  ;;  %p1061_p0 = pneg %p1060_p13 }
  0xe2   : > { %749 = vmatpush.bf16.msrb.mxu0 %v740_v51 }
  0xe3   : > { %v616_v54 = vmin.f32 %v614_v52, %v615_v53  ;;  %v967_v52 = vld [vmem:[%s1355_s4] sm:$0xff]  ;;  %v1123_v53 = vmov 0  }
  0xe4   : > { %1029 = vset.pattern.permute.xlu1 %v1123_v53  ;;  %1028 = vset.pattern.permute.xlu0 %v1123_v53 }
  0xe5   : > { %vm617_vm6 = vcmp.le.f32.partialorder %v609_v47, %v616_v54  ;;  %vm626_vm7 = vcmp.lt.f32.partialorder %v616_v54, 1e+30  ;;  %961 = vmatmul.msk.bf16.vlgmr.msrb.gmra.mxu0 %vm734_vm14, %v967_v52  ;;  %760 = vperm.xlu0 %1028, %v756_v46  }
  0xe6   : > { %v618_v55 = vsel %vm617_vm6, %v1251_v36, 1e+09  ;;  %v627_v9 = vsel %vm626_vm7, %v616_v54, 1e+30  ;;  %v1124_v54 = vmov 1  }
  0xe7   : > { %v619_v56 = vsel %vm588_vm2, %v618_v55, inf  ;;  %v653_v13 = vadd.f32 %v627_v9, %v425_v10  ;;  %1031 = vset.pattern.permute.xlu2 %v1124_v54  ;;  %v800_v55 = vld [vmem:[%s1359_s8] sm:$0xff] }
  0xe8   : > { %v620_v57 = vrot.slane %v619_v56, 4 }
  0xe9   : > { %v654_v17 = vmax.f32 %v653_v13, 1e-10  ;;  %v783_v13 = vld [vmem:[%s1358_s7] sm:$0xf] }
  0xea   : > { %v621_v58 = vmin.f32 %v619_v56, %v620_v57 }
  0xeb   : > { %1034 = vrcp.f32 %v654_v17 }
  0xec   : > { %v622_v59 = vrot.slane %v621_v58, 2  ;;  %1036 = vrcp.f32 %v651_v18 }
  0xed   : > { %1033 = vset.pattern.permute.xlu0 %v1124_v54 }
  0xee   : > { %v623_v60 = vmin.f32 %v621_v58, %v622_v59  ;;  %v968_v59 = vld [vmem:[%s1356_s5] sm:$0xff] }
  0xf0   : > { %v624_v62 = vrot.slane %v623_v60, 1 }
  0xf1   : > { %v1035_v27 = vpop.eup %1034 }
  0xf2   : > { %v625_v63 = vmin.f32 %v623_v60, %v624_v62  ;;  %v1037_v28 = vpop.eup %1036 }
  0xf3   : > { %v659_v30 = vadd.f32 %v1037_v28, %v1035_v27 }
  0xf4   : > { %v628_v2 = vsel %vm626_vm7, %v625_v63, 0.0 }
  0xf5   : > { %vm629_vm8 = vcmp.eq.f32.partialorder %v1251_v36, %v628_v2 }
  0xf6   : > { %v630_v3 = vsel %vm629_vm8, 1e+30, %v609_v47  ;;  %v416_v47 = vld [vmem:[%s407_s26] sm:$0x3f]  ;;  %s392_s26 = scalar_lea.vmem [#allocation2], %s946_s16  ;;  %s1062_s16 = scalar_lea.hbm %s1360_s9, 16 }
  0xf7   : > { %v631_v4 = vsel %vm588_vm2, %v630_v3, inf  ;;  %s828_s27 = sshll.u32 %s392_s26, 4  ;;  %p1064_p2 = scmp.lt.s32.totalorder %s1062_s16, %s1058_s29  ;;  %s829_s27 = int_to_ptr.vmem [resolvable:$true] %s828_s27 }
  0xf8   : > { %v632_v7 = vrot.slane %v631_v4, 4 }
  0xf9   : > { %p1065_p3 = por %p1064_p2, %p1063_p1 }
  0xfa   : > { %v633_v8 = vmin.f32 %v631_v4, %v632_v7 }
  0xfb   : > { %p1066_p5 = pnand %p1065_p3, %p1061_p0 }
  0xfc   : > { %v634_v11 = vrot.slane %v633_v8, 2 }
  0xfe   : > { %v635_v12 = vmin.f32 %v633_v8, %v634_v11 }
 0x100   : > { %v636_v14 = vrot.slane %v635_v12, 1 }
 0x102   : > { %v637_v16 = vmin.f32 %v635_v12, %v636_v14 }
 0x104   : > { %vm638_vm9 = vcmp.le.f32.partialorder %v630_v3, %v637_v16  ;;  %vm647_vm10 = vcmp.lt.f32.partialorder %v637_v16, 1e+30 }
 0x105   : > { %v639_v19 = vsel %vm638_vm9, %v1251_v36, 1e+09  ;;  %v648_v20 = vsel %vm647_vm10, %v637_v16, 1e+30 }
 0x106   : > { %v640_v21 = vsel %vm588_vm2, %v639_v19, inf  ;;  %v656_v22 = vadd.f32 %v648_v20, %v425_v10 }
 0x107   : > { %v641_v23 = vrot.slane %v640_v21, 4 }
 0x108   : > { %v657_v24 = vmax.f32 %v656_v22, 1e-10 }
 0x109   : > { %v642_v25 = vmin.f32 %v640_v21, %v641_v23 }
 0x10a   : > { %1038 = vrcp.f32 %v657_v24 }
 0x10b   : > { %v643_v26 = vrot.slane %v642_v25, 2 }
 0x10d   : > { %v644_v29 = vmin.f32 %v642_v25, %v643_v26 }
 0x10f   : > { %v645_v33 = vrot.slane %v644_v29, 1 }
 0x110   : > { %v1039_v31 = vpop.eup %1038 }
 0x111   : > { %v660_v32 = vadd.f32 %v1039_v31, %v659_v30  ;;  %v646_v34 = vmin.f32 %v644_v29, %v645_v33 }
 0x113   : > { %1040 = vrcp.f32 %v660_v32  ;;  %v649_v37 = vsel %vm647_vm10, %v646_v34, 0.0 }
 0x114   : > { %vm665_vm11 = vcmp.eq.f32.partialorder %v1251_v36, %v649_v37  ;;  %v757_v36 = vld [vmem:[%s1357_s6 + $0x8] sm:$0xff] }
 0x115   : > { %765 = vperm.xlu1 %1029, %v757_v36   ;;  %775 = vperm.xlu2 %1031, %v757_v36  }
 0x119   : > { %v1041_v35 = vpop.eup %1040 }
 0x11a   : > { %v662_v38 = vmul.f32 %v1041_v35, %v1037_v28  ;;  %v663_v39 = vmul.f32 %v1041_v35, %v1035_v27  ;;  %v664_v40 = vmul.f32 %v1041_v35, %v1039_v31 }
 0x11c   : > { %v666_v41 = vperm.slane %v664_v40, 0  ;;  %v668_v42 = vperm.slane %v663_v39, 0  ;;  %v670_v44 = vperm.slane %v662_v38, 0 }
 0x11d   : > { %1030 = vset.pattern.permute.xlu1 %v1124_v54  ;;  %1032 = vset.pattern.permute.xlu2 %v1123_v53 }
 0x11e   : > { %v667_v43 = vsel %vm665_vm11, %v666_v41, 0.0  ;;  %771 = vperm.xlu1 %1030, %v756_v46   ;;  %803 = vperm.xlu2 %1032, %v800_v55  }
 0x11f   : > { %v669_v45 = vsel %vm629_vm8, %v668_v42, %v667_v43 }
 0x120   : > { %v671_v48 = vsel %vm608_vm5, %v670_v44, %v669_v45 }
 0x121   : > { %691 = vmatpush.msra.mxu2 %v671_v48 }
 0x122   : > { %951 = vmatmul.msk.f32.vlgmr.msra.gmra.mxu2 %vm672_vm12, %v416_v47 }
 0x126   : > { %808 = vperm.xlu1 %1030, %v800_v55  }
 0x157   : > { %v761_v0 = vpop.permute.xlu0 %760 }
 0x162   : > { %v751_v60 = vpop.f32.mrf.mxu0 }
 0x16a   : > { %v753_v2 = vpop.f32.mrf.mxu0 }
 0x16f   : > { %v776_v7 = vpop.permute.xlu2 %775 }
 0x178   : > { %v804_v14 = vpop.permute.xlu2 %803 }
 0x187   : > { %v766_v61 = vpop.permute.xlu1 %765 }
 0x190   : > { %v772_v4 = vpop.permute.xlu1 %771 }
 0x198   : > { %v809_v17 = vpop.permute.xlu1 %808 }
 0x1a5   : > { %v693_v56 = vpop.f32.mrf.mxu2 }
 0x1a6   : > { %v696_v57 = vpack.c.bf16 %v693_v56, %v693_v56 }
 0x1a8   : > { %v713_v58 = vsel %vm438_vm0, %v696_v57, 0 }
 0x1a9   : > { %722 = vmatpush.bf16.msrb.mxu3 %v713_v58 }
 0x1ac   : > { %956 = vmatmul.msk.bf16.vlgmr.msrb.gmra.mxu3 %vm708_vm15, %v968_v59 }
 0x22f   : > { %v724_v62 = vpop.f32.mrf.mxu3 }
 0x230   : > { %v752_v63 = vadd.f32 %v751_v60, %v724_v62 }
 0x232   : > { %v768_v3 = vmul.f32 %v761_v0, %v752_v63 }
 0x234   : > { %v778_v8 = vadd.f32 %v772_v4, %v768_v3 }
 0x236   : > { %v780_v11 = vmax.f32 %v778_v8, 0.0 }
 0x237   : > { %v726_v5 = vpop.f32.mrf.mxu3 }
 0x238   : > { %v754_v6 = vadd.f32 %v753_v2, %v726_v5 }
 0x23a   : > { %v769_v9 = vmul.f32 %v766_v61, %v754_v6 }
 0x23c   : > { %v779_v10 = vadd.f32 %v776_v7, %v769_v9 }
 0x23e   : > { %v781_v1 = vmax.f32 %v779_v10, 0.0 }
 0x240   : > { %v782_v12 = vpack.c.bf16 %v781_v1, %v780_v11 }
 0x242   : > { %794 = vmatpush.bf16.msra.mxu1 %v782_v12 }
 0x245   : > { %962 = vmatmul.msk.bf16.vlgmr.msra.gmra.mxu1 %vm588_vm2, %v783_v13 }
 0x2c2   : > { %v796_v15 = vpop.f32.mrf.mxu1 }
 0x2c3   : > { %v806_v16 = vmul.f32 %v804_v14, %v796_v15 }
 0x2c5   : > { %v811_v18 = vadd.f32 %v809_v17, %v806_v16 }
 0x2c7   : > { %v812_v19 = vmax.f32 %v811_v18, 0.0 }
 0x2c9   : > { %813 = vst.msk [vmem:[%s392_s26] sm:$0xff] %vm588_vm2, %v812_v19 }
 0x2ca   : > { %v798_v20 = vpop.f32.mrf.mxu1 }
 0x2cb   : > { %1069 = shalt.err (!%p1066_p5)
}
 0x2cc   : > { %969 = dma.vmem_to_hbm [thread:$0]  (%p1215_p4), %s829_s27, 128, %s831_s28, %s815_s12  }
 0x2cd PF: > { %p975_p6 = scmp.ge.s32.totalorder %s1120_s14, 2  ;;  %s842_s15 = sand.u32 1, %s1100_s30  }
 0x2ce   : > { %s843_s26 = scalar_lea.sflag [#allocation3], %s842_s15 }
 0x2cf   : > { %p972_p7 = pnand %p975_p6, %p1222_p8 }
 0x2d1   : > { %p973_p9 = pneg %p972_p7 }
 0x2d3   : > { %1095 = dma.done.wait (%p973_p9), %s843_s26, 128  }
 0x2d4   : > { %1097 = vsyncadd (%p973_p9), %s843_s26, 4294967168  ;;  %s22_s14 = sadd.s32 1, %s1120_s14   ;;  %s1363_s30 = smov %s1104_s10 }
 0x2d5   : > { %p19_p10 = scmp.ge.s32.totalorder %s22_s14, 4   ;;  %s1364_s10 = smov %s1108_s11 }
 0x2d6   : > { %s1365_s11 = smov %s1228_s22  ;;  %s1366_s12 = smov %s1116_s13 }
 0x2d7   : > { %s1367_s13 = smov %s1369_s17  ;;  %21 = sbr.rel (!%p19_p10) target bundleno = 4 (0x4), region = 100 }
 0x2dc   :  { %849 = vsyncpa [#allocation3], 1 }
 0x2dd   :  { %851 = vsyncpa [#allocation3 + $0x1], 1 }

</bundles_post_ra>
